<compile_context>
chip_gen: v7x
topology: tpu7x:2x2x1
jax: 0.10.0
libtpu: 0.0.40
codegen_flags: <defaults>
</compile_context>

<pallas_src>
import math

import jax
import jax.numpy as jnp
from jax.experimental import pallas as pl
from jax.experimental.pallas import tpu as pltpu


def _delta_dropout_kernel(z_ref, mask_ref, o_ref):
    # z_ref:    (Bn, Bd, Bf) tile of the input
    # mask_ref: (Bn, 1,  Bf) per-batch feature keep-mask (0.0 / 1.0)
    # o_ref:    (Bn, Bd, Bf) output tile
    o_ref[...] = z_ref[...] * mask_ref[...]   # (Bn,1,Bf) broadcasts over dim


def _choose_blocks(n, d, f, itemsize, target_bytes):
    """Pick (Bn, Bd, Bf) so one z tile is ~target_bytes.

    Bd is a multiple of the dtype's sublane packing (or the full dim), Bf is a
    multiple of 128 (or the full feature width), and when the whole batch fits
    one tile we still split it into ~cdiv(n, 4) steps for v7x megacore balance.
    """
    sub = max(8, 8 * (4 // max(1, itemsize)))     # 8 f32 / 16 bf16 / 32 int8
    row = f * itemsize                            # one dim-row at full F

    if sub * row > target_bytes and f > 128:
        # Even a minimal sublane slab at full F busts the budget: tile F in
        # 128-lane multiples (keeps v7x's 64 MiB VMEM valid for very wide F).
        bd = min(sub, d)
        bf = max(128, (target_bytes // (bd * itemsize)) // 128 * 128)
        bf = min(bf, f)
        bn = 1
    elif d * row > target_bytes:
        # Tile dim in sublane-packing multiples.
        bf = f
        bd = max(sub, (target_bytes // row) // sub * sub)
        bd = min(bd, d)
        bn = 1
    else:
        # Pack several batch elements per tile.
        bf = f
        bd = d
        per_elem = d * row
        bn = min(n, max(1, target_bytes // per_elem))
        if bn >= n and n >= 2:
            # v7x megacore: give the two TensorCores >= 2 roughly equal grid
            # steps each instead of one big (or lopsided) step.
            bn = max(1, pl.cdiv(n, 4))
    return bn, bd, bf


def _delta_dropout_apply_3d(z3, mask3, *, target_tile_bytes, donate_z):
    """pallas_call for z3: (N, D, F) * mask3: (N, 1, F)."""
    n, d, f = z3.shape
    itemsize = z3.dtype.itemsize
    bn, bd, bf = _choose_blocks(n, d, f, itemsize, target_tile_bytes)
    grid = (pl.cdiv(n, bn), pl.cdiv(d, bd), pl.cdiv(f, bf))

    # Explicit scoped-VMEM budget: double-buffered z + out + mask, plus slack.
    z_tile = bn * bd * bf * itemsize
    m_tile = bn * bf * itemsize
    need = 2 * (2 * z_tile + m_tile) + (4 << 20)
    vmem_limit = int(min(48 << 20, max(32 << 20, need)))

    cost = pl.CostEstimate(
        flops=n * d * f,
        transcendentals=0,
        bytes_accessed=(2 * n * d * f + n * f) * itemsize,
    )

    return pl.pallas_call(
        _delta_dropout_kernel,
        out_shape=jax.ShapeDtypeStruct((n, d, f), z3.dtype),
        grid_spec=pltpu.PrefetchScalarGridSpec(
            num_scalar_prefetch=0,
            grid=grid,
            in_specs=[
                pl.BlockSpec((bn, bd, bf), lambda i, j, k: (i, j, k)),
                pl.BlockSpec((bn, 1, bf), lambda i, j, k: (i, 0, k)),
            ],
            out_specs=pl.BlockSpec((bn, bd, bf), lambda i, j, k: (i, j, k)),
        ),
        compiler_params=pltpu.CompilerParams(
            dimension_semantics=("parallel", "parallel", "parallel"),
            vmem_limit_bytes=vmem_limit,
        ),
        cost_estimate=cost,
        input_output_aliases={0: 0} if donate_z else {},
    )(z3, mask3)


def delta_dropout_apply(z, feat_mask, *, target_tile_bytes=6 * 1024 * 1024,
                        donate_z=False):
    """Masked multiply `z * feat_mask[:, None, :]` on TPU via Pallas.

    z:         (N, dim, F) float array
    feat_mask: (N, F) array of 0/1 keep flags
    donate_z:  alias z with the output (halves HBM footprint); the caller must
               actually donate z (jit donate_argnums) for it to take effect.
    """
    n, d, f = z.shape
    mask = feat_mask.astype(z.dtype)

    if f < 128:
        # Lane-dense repack: view z as (N, dim*F/L, L) with L = lcm(F, 128)
        # (a multiple of 128), and pre-tile the tiny (N, F) mask to (N, 1, L).
        # Each L-lane group then sees the same per-feature mask, so the kernel
        # is an ordinary broadcast multiply over full-width lanes.
        lane = (f * 128) // math.gcd(f, 128)
        if (d * f) % lane == 0:
            reps = lane // f
            z_eff = z.reshape(n, (d * f) // lane, lane)
            m_eff = jnp.tile(mask, (1, reps)).reshape(n, 1, lane)
            out = _delta_dropout_apply_3d(
                z_eff, m_eff, target_tile_bytes=target_tile_bytes,
                donate_z=donate_z)
            return out.reshape(n, d, f)
        # TODO(synk): shapes where dim*F isn't a multiple of lcm(F, 128) fall
        # through to a sub-128-lane (masked-store) layout: correct, not peak.

    return _delta_dropout_apply_3d(
        z, mask.reshape(n, 1, f), target_tile_bytes=target_tile_bytes,
        donate_z=donate_z)


def make_feature_mask(key, batch_size, num_features, delta, dtype=jnp.float32):
    """(N, F) array of 0/1 keep flags matching the PyTorch reference RNG law.

    Per batch element: c ~ Uniform{1, ..., delta+1} (== np.random.choice(delta+1)+1);
    keep c distinct feature indices chosen uniformly without replacement.
    """
    keys = jax.random.split(key, batch_size)

    def one_batch(k):
        kc, kp = jax.random.split(k)
        c = jax.random.randint(kc, (), 1, delta + 2)        # in {1,...,delta+1}
        ranks = jax.random.permutation(kp, num_features)    # distinct, tie-free
        return (ranks < c).astype(dtype)

    return jax.vmap(one_batch)(keys)


# Below this, XLA's fused multiply (fused into z's producer, no extra HBM
# round trip) beats a standalone pallas_call's launch + grid overhead.
_MIN_PALLAS_BYTES = 4 * 1024 * 1024


def delta_dropout(z, delta, key, enabled=True, use_pallas=None):
    """Full DeltaDropout forward: RNG glue in JAX, masked multiply in Pallas."""
    if not enabled:
        return z
    n, _, f = z.shape
    feat_mask = make_feature_mask(key, n, f, delta, dtype=z.dtype)
    if use_pallas is None:
        use_pallas = z.size * z.dtype.itemsize >= _MIN_PALLAS_BYTES
    if not use_pallas:
        return z * feat_mask[:, None, :]
    return delta_dropout_apply(z, feat_mask)


if __name__ == "__main__":
    root = jax.random.PRNGKey(0)
    k_z1, k_m1, k_z2, k_m2, k_z3, k_m3, k_z4, k_m4 = jax.random.split(root, 8)

    # Case 1: docstring-style shape (N, dim, n_features) with F < 128.
    # Exercises the lane-dense repack path: (2, 8, 16) -> (2, 1, 128).
    N1, dim1, F1, delta1 = 2, 8, 16, 4
    z1 = jax.random.normal(k_z1, (N1, dim1, F1), dtype=jnp.float32)
    m1 = make_feature_mask(k_m1, N1, F1, delta1, dtype=z1.dtype)
    out1 = jax.block_until_ready(delta_dropout_apply(z1, m1))
    ref1 = z1 * m1[:, None, :]
    assert out1.shape == z1.shape
    assert bool(jnp.allclose(out1, ref1)), "case 1: Pallas output mismatch"

    # Case 2: lane-dense F (multiple of 128) + ragged batch tiling
    # (N=5 -> Bn=cdiv(5,4)=2, grid steps 2,2,1) through the full wrapper.
    N2, dim2, F2, delta2 = 5, 8, 128, 3
    z2 = jax.random.normal(k_z2, (N2, dim2, F2), dtype=jnp.float32)
    out2 = jax.block_until_ready(
        delta_dropout(z2, delta2, k_m2, enabled=True, use_pallas=True))
    m2 = make_feature_mask(k_m2, N2, F2, delta2, dtype=z2.dtype)
    ref2 = z2 * m2[:, None, :]
    assert bool(jnp.allclose(out2, ref2)), "case 2: Pallas output mismatch"
    kept = jnp.sum(m2, axis=-1)
    assert bool(jnp.all((kept >= 1) & (kept <= delta2 + 1)))

    # Case 3: F >= 128 but not a multiple of 128 (full-F block, ragged lanes).
    N3, dim3, F3, delta3 = 3, 8, 192, 2
    z3 = jax.random.normal(k_z3, (N3, dim3, F3), dtype=jnp.float32)
    m3 = make_feature_mask(k_m3, N3, F3, delta3, dtype=z3.dtype)
    out3 = jax.block_until_ready(delta_dropout_apply(z3, m3))
    assert bool(jnp.allclose(out3, z3 * m3[:, None, :])), "case 3 mismatch"

    # Case 4: awkward F (no clean 128-lane repack) -> masked-store fallback.
    N4, dim4, F4, delta4 = 2, 10, 24, 5
    z4 = jax.random.normal(k_z4, (N4, dim4, F4), dtype=jnp.float32)
    m4 = make_feature_mask(k_m4, N4, F4, delta4, dtype=z4.dtype)
    out4 = jax.block_until_ready(delta_dropout_apply(z4, m4))
    assert bool(jnp.allclose(out4, z4 * m4[:, None, :])), "case 4 mismatch"

    # Disabled path returns z unchanged.
    assert delta_dropout(z1, delta1, k_m1, enabled=False) is z1

    print("KERNEL_OK")
</pallas_src>

<mosaic_0001>
module attributes {stable_mosaic.version = 11 : i64} {
  func.func @_delta_dropout_kernel(%arg0: i32, %arg1: i32, %arg2: i32, %arg3: memref<1x1x128xf32, #tpu.memory_space<vmem>>, %arg4: memref<1x1x128xf32, #tpu.memory_space<vmem>>, %arg5: memref<1x1x128xf32, #tpu.memory_space<vmem>>) attributes {dimension_semantics = [#tpu.dimension_semantics<parallel>, #tpu.dimension_semantics<parallel>, #tpu.dimension_semantics<parallel>], iteration_bounds = array<i64: 2, 1, 1>, scalar_prefetch = 0 : i64, scratch_operands = 0 : i64, tpu.core_type = #tpu.core_type<tc>, window_params = [{transform_indices = @transform_0, window_bounds = array<i64: 1, 1, 128>}, {transform_indices = @transform_1, window_bounds = array<i64: 1, 1, 128>}, {transform_indices = @transform_2, window_bounds = array<i64: 1, 1, 128>}]} {
    %c0 = arith.constant 0 : index
    %c0_0 = arith.constant 0 : index
    %c0_1 = arith.constant 0 : index
    %0 = vector.load %arg3[%c0, %c0_0, %c0_1] : memref<1x1x128xf32, #tpu.memory_space<vmem>>, vector<1x1x128xf32>
    %c0_2 = arith.constant 0 : index
    %c0_3 = arith.constant 0 : index
    %c0_4 = arith.constant 0 : index
    %1 = vector.load %arg4[%c0_2, %c0_3, %c0_4] : memref<1x1x128xf32, #tpu.memory_space<vmem>>, vector<1x1x128xf32>
    %2 = arith.mulf %0, %1 : vector<1x1x128xf32>
    %c0_5 = arith.constant 0 : index
    %c0_6 = arith.constant 0 : index
    %c0_7 = arith.constant 0 : index
    %3 = vector.load %arg5[%c0_5, %c0_6, %c0_7] : memref<1x1x128xf32, #tpu.memory_space<vmem>>, vector<1x1x128xf32>
    tpu.vector_store %arg5[%c0_5, %c0_6, %c0_7], %2 {strides = array<i32>} : memref<1x1x128xf32, #tpu.memory_space<vmem>>, vector<1x1x128xf32>,
    return
  }
  func.func @transform_0(%arg0: i32, %arg1: i32, %arg2: i32) -> (i32, i32, i32) {
    %c0_i32 = arith.constant 0 : i32
    return %arg0, %arg1, %arg2 : i32, i32, i32
  }
  func.func @transform_1(%arg0: i32, %arg1: i32, %arg2: i32) -> (i32, i32, i32) {
    %c0_i32 = arith.constant 0 : i32
    %c0_i32_0 = arith.constant 0 : i32
    return %arg0, %c0_i32, %arg2 : i32, i32, i32
  }
  func.func @transform_2(%arg0: i32, %arg1: i32, %arg2: i32) -> (i32, i32, i32) {
    %c0_i32 = arith.constant 0 : i32
    return %arg0, %arg1, %arg2 : i32, i32, i32
  }
}

</mosaic_0001>

<bundles_post_ra>
// kernel: tpu_custom_call.1
= control target key start
LH: loop header
LB: loop body
LE: loop exit
PB: predicated region body
PF: predicated region fallthrough
CT: control target
= control target key end

     0   :  { %7 = vsyncpa [#allocation3], 0  ;;  %s698_s0 = inlined_call_operand.hbm [shape: f32[2,1,128], index: 0, kind: input, shape index: {}]   ;;  %s699_s1 = inlined_call_operand.vmem [shape: f32[2,1,128], index: 1, kind: input, shape index: {}]   ;;  %s700_s2 = inlined_call_operand.hbm [shape: f32[2,1,128], index: 2, kind: output, shape index: {}]  }
   0x1   :  { %9 = vsyncpa [#allocation3 + $0x1], 0 }
   0x2   :  { %10 = vsyncpa [#allocation4], 0 }
   0x3   :  { %12 = vsyncpa [#allocation4 + $0x1], 0  ;;  %s520_s9 = smov 0   ;;  %s522_s10 = smov 0  }
   0x4   :  { %s524_s11 = smov 0   ;;  %s526_s12 = smov 0  }
   0x5   :  { %s528_s13 = smov 0   ;;  %s530_s14 = smov 0  }
   0x6 LB: > { %s318_s15 = sadd.s32 4294967295, %s501_s14   ;;  %s319_s16 = sadd.s32 4294967294, %s501_s14   ;;  %s501_s14 = sphi %s530_s14, %s18_s14   ;;  %s497_s13 = sphi %s528_s13, %s716_s13   ;;  %s493_s12 = sphi %s526_s12, %s715_s12   ;;  %s489_s11 = sphi %s524_s11, %s714_s11   ;;  %s485_s10 = sphi %s522_s10, %s713_s10   ;;  %s481_s9 = sphi %s520_s9, %s712_s9  }
   0x7   : > { %s37_s17 = sadd.s32 1, %s497_s13  ;;  %s48_s18 = sadd.s32 1, %s489_s11 }
   0x8   : > { %p39_p0 = scmp.ge.s32.totalorder %s37_s17, 2  ;;  %p55_p1 = scmp.ne.s32.totalorder %s489_s11, %s485_s10 }
   0x9   : > { %p56_p2 = scmp.eq.s32.totalorder %s501_s14, 0  ;;  %p61_p3 = scmp.ne.s32.totalorder %s485_s10, %s481_s9 }
   0xa   : > { %s718_s17 = smov (%p39_p0, %s37_s17), 0  ;;  %p62_p5 = scmp.eq.s32.totalorder %s318_s15, 0 }
   0xb   : > { %p561_p4 = por %p56_p2, %p55_p1  ;;  %s41_s20 = ssub.s32 %s497_s13, %s718_s17 }
   0xc   : > { %p117_p6 = scmp.eq.s32.totalorder %s318_s15, 1  ;;  %p46_p7 = scmp.eq.s32.totalorder %s41_s20, 0 }
   0xd   : > { %p567_p8 = por %p62_p5, %p61_p3  ;;  %p123_p10 = scmp.eq.s32.totalorder %s319_s16, 1 }
   0xe   : > { %p571_p9 = por %p117_p6, %p55_p1  ;;  %p339_p13 = scmp.lt.s32.totalorder %s501_s14, 2 }
   0xf   : > { %s576_s23 = scalar_select %p46_p7, %s489_s11, %s48_s18  }
  0x10   : > { %s704_s22 = scalar_select %p571_p9, 1, 0 }
  0x11   : > { %p578_p11 = por %p123_p10, %p61_p3  ;;  %s143_s25 = sand.u32 1, %s489_s11  }
  0x12   : > { %s322_s26 = sshll.u32 %s497_s13, 4  ;;  %s146_s27 = scalar_lea.vmem [#allocation2], %s143_s25 }
  0x13   : > { %s705_s24 = scalar_select %p578_p11, 1, 0 }
  0x14   : > { %s155_s28 = sshll.u32 %s146_s27, 4  ;;  %s589_s3 = scalar_lea.hbm %s698_s0, %s322_s26  ;;  %s591_s28 = int_to_ptr.vmem [resolvable:$true] %s155_s28 }
  0x15   : > { %p595_p0 = pnand %p339_p13, %p561_p4  ;;  %s144_s5 = scalar_lea.sflag [#allocation3], %s143_s25 }
  0x16   : > { %s389_s6 = scalar_lea.hbm %s589_s3, 16  ;;  %s394_s15 = scalar_lea.hbm %s698_s0, 32 }
  0x17   : > { %p390_p3 = scmp.ne.s32.totalorder %s589_s3, %s389_s6  ;;  %p391_p5 = pneg %p595_p0 }
  0x18   : > { %p395_p4 = scmp.lt.u32.totalorder %s589_s3, %s698_s0  ;;  %p396_p10 = scmp.lt.u32.totalorder %s394_s15, %s389_s6 }
  0x19   : > { %p392_p6 = pnand %p391_p5, %p390_p3  ;;  %p398_p12 = scmp.lt.u32.totalorder %s389_s6, %s589_s3 }
  0x1a   : > { %p397_p13 = por %p396_p10, %p395_p4 }
  0x1b   : > { %p393_p7 = pneg %p392_p6 }
  0x1c   : > { %p399_p1 = por %p398_p12, %p397_p13 }
  0x1e   : > { %p400_p2 = pnand %p399_p1, %p393_p7 }
  0x20   : > { %403 = shalt.err (!%p400_p2)
}
  0x21   : > { %s404_s19 = scalar_lea.vmem %s591_s28, 16  ;;  %s503_s20 = smov [#allocation2]  }
  0x22   : > { %p405_p3 = scmp.ne.s32.totalorder %s591_s28, %s404_s19  ;;  %s409_s25 = sshll.u32 %s503_s20, 4  ;;  %s410_s25 = int_to_ptr.vmem [resolvable:$false] %s409_s25 }
  0x23   : > { %s411_s26 = scalar_lea.vmem %s410_s25, 32  ;;  %p412_p9 = scmp.lt.s32.totalorder %s591_s28, %s410_s25 }
  0x24   : > { %p407_p6 = pnand %p405_p3, %p391_p5  ;;  %p413_p4 = scmp.lt.s32.totalorder %s411_s26, %s404_s19 }
  0x26   : > { %p408_p11 = pneg %p407_p6  ;;  %p414_p10 = por %p413_p4, %p412_p9 }
  0x28   : > { %p415_p12 = pnand %p414_p10, %p408_p11 }
  0x2a   : > { %418 = shalt.err (!%p415_p12)
}
  0x2b   : > { %334 = dma.hbm_to_vmem [thread:$0]  (!%p595_p0), %s589_s3, 16, %s591_s28, %s144_s5  }
  0x2c   : > { %p707_p1 = scmp.lt.s32.totalorder %s501_s14, 3  ;;  %p708_p2 = scmp.ge.s32.totalorder %s501_s14, 1 }
  0x2e   : > { %p170_p5 = pnand %p708_p2, %p707_p1 }
  0x2f   : > { %s631_s27 = sand.u32 (!%p170_p5), 1, %s485_s10  }
  0x30   : > { %173 = sbr.rel (%p170_p5) target bundleno = 84 (0x54), region = 28  ;;  %s176_s29 = scalar_lea.sflag (!%p170_p5), [#allocation3], %s631_s27 }
  0x31   : > { %s178_s30 = scalar_lea.vmem (!%p170_p5), [#allocation2], %s631_s27 }
  0x37   : > { %472 = dma.done.wait (%p567_p8), %s176_s29, 16  }
  0x38   : > { %474 = vsyncadd (%p567_p8), %s176_s29, 4294967280  ;;  %p203_p9 = scmp.lt.s32.totalorder %s493_s12, 1  ;;  %s202_s6 = scalar_lea.vmem [#allocation5], %s631_s27  ;;  %v209_v0 = vld [vmem:[%s178_s30] sm:$0x1] }
  0x39   : > { %s228_s7 = sshll.u32 %s202_s6, 4  ;;  %s324_s8 = sshll.u32 %s493_s12, 4  ;;  %s646_s7 = int_to_ptr.vmem [resolvable:$true] %s228_s7 }
  0x3a   : > { %s204_s28 = scalar_select %p203_p9, %s493_s12, 1 }
  0x3b   : > { %s651_s16 = scalar_lea.hbm %s700_s2, %s324_s8  ;;  %s214_s18 = scalar_lea.sflag [#allocation4], %s631_s27 }
  0x3c   : > { %s208_s5 = scalar_lea.vmem %s699_s1, %s204_s28  ;;  %s419_s19 = scalar_lea.vmem %s646_s7, 16 }
  0x3d   : > { %v210_v1 = vld [vmem:[%s208_s5] sm:$0x1]  ;;  %p420_p8 = scmp.ne.s32.totalorder %s646_s7, %s419_s19  ;;  %p709_p11 = scmp.ne.s32.totalorder %s704_s22, 0 }
  0x3e   : > { %v211_v2 = vmul.f32 %v210_v1, %v209_v0  ;;  %s504_s12 = smov [#allocation5]  }
  0x3f   : > { %p421_p0 = pnand %p420_p8, %p709_p11  ;;  %s423_s20 = sshll.u32 %s504_s12, 4  ;;  %s424_s20 = int_to_ptr.vmem [resolvable:$false] %s423_s20 }
  0x40   : > { %212 = vst [vmem:[%s202_s6] sm:$0x1] %v211_v2  ;;  %s425_s25 = scalar_lea.vmem %s424_s20, 32  ;;  %p426_p13 = scmp.lt.s32.totalorder %s646_s7, %s424_s20 }
  0x41   : > { %p422_p7 = pneg %p421_p0  ;;  %p427_p3 = scmp.lt.s32.totalorder %s425_s25, %s419_s19 }
  0x43   : > { %p428_p6 = por %p427_p3, %p426_p13 }
  0x45   : > { %p429_p4 = pnand %p428_p6, %p422_p7 }
  0x47   : > { %432 = shalt.err (!%p429_p4)
}
  0x48   : > { %s433_s26 = scalar_lea.hbm %s651_s16, 16  ;;  %s437_s30 = scalar_lea.hbm %s700_s2, 32 }
  0x49   : > { %p434_p10 = scmp.ne.s32.totalorder %s651_s16, %s433_s26  ;;  %p438_p2 = scmp.lt.u32.totalorder %s651_s16, %s700_s2 }
  0x4a   : > { %p439_p5 = scmp.lt.u32.totalorder %s437_s30, %s433_s26  ;;  %p441_p8 = scmp.lt.u32.totalorder %s433_s26, %s651_s16 }
  0x4b   : > { %p435_p12 = pnand %p434_p10, %p709_p11 }
  0x4c   : > { %p440_p9 = por %p439_p5, %p438_p2 }
  0x4d   : > { %p436_p1 = pneg %p435_p12 }
  0x4e   : > { %p442_p0 = por %p441_p8, %p440_p9 }
  0x50   : > { %p443_p7 = pnand %p442_p0, %p436_p1 }
  0x52   : > { %446 = shalt.err (!%p443_p7)
}
  0x53   : > { %329 = dma.vmem_to_hbm [thread:$0]  (%p709_p11), %s646_s7, 16, %s651_s16, %s214_s18  }
  0x54 PF: > { %s240_s4 = sand.u32 1, %s481_s9   ;;  %p710_p13 = scmp.ne.s32.totalorder %s705_s24, 0 }
  0x55   : > { %p711_p3 = scmp.ge.s32.totalorder %s501_s14, 2  ;;  %s241_s5 = scalar_lea.sflag [#allocation4], %s240_s4 }
  0x57   : > { %p336_p6 = pnand %p711_p3, %p710_p13 }
  0x59   : > { %476 = dma.done.wait (!%p336_p6), %s241_s5, 16  }
  0x5a   : > { %478 = vsyncadd (!%p336_p6), %s241_s5, 4294967280  ;;  %s18_s14 = sadd.s32 1, %s501_s14   ;;  %s712_s9 = smov %s485_s10 }
  0x5b   : > { %p15_p4 = scmp.ge.s32.totalorder %s18_s14, 4   ;;  %s713_s10 = smov %s489_s11 }
  0x5c   : > { %s714_s11 = smov %s576_s23  ;;  %s715_s12 = smov %s497_s13 }
  0x5d   : > { %s716_s13 = smov %s718_s17  ;;  %17 = sbr.rel (!%p15_p4) target bundleno = 6 (0x6), region = 76 }
  0x64   :  { %245 = vsyncpa [#allocation3], 1 }
  0x65   :  { %247 = vsyncpa [#allocation3 + $0x1], 1 }
  0x66   :  { %248 = vsyncpa [#allocation4], 1 }
  0x67   :  { %250 = vsyncpa [#allocation4 + $0x1], 1 }

</bundles_post_ra>
